<compile_context>
chip_gen: v7x
topology: tpu7x:2x2x1
jax: 0.10.0
libtpu: 0.0.40
codegen_flags: <defaults>
</compile_context>

<pallas_src>
import functools

import jax
import jax.numpy as jnp
from jax.experimental import pallas as pl
from jax.experimental.pallas import tpu as pltpu


_TARGET_BLOCK_BYTES = 4 << 20   # ~4 MiB of logits per grid step


# ---------------------------------------------------------------------------
# Kernels
# ---------------------------------------------------------------------------
def _ls_ce_kernel(pred_ref, tgt_ref, out_ref, *, smoothing_coeff, n_classes):
    """Single pass: the whole class axis fits in one block."""
    x = pred_ref[...].astype(jnp.float32)                        # (tn, C)
    t = tgt_ref[...]                                             # (tn, 1) int32

    m = jnp.max(x, axis=1, keepdims=True)                        # (tn, 1)
    sumexp = jnp.sum(jnp.exp(x - m), axis=1, keepdims=True)      # (tn, 1)

    col = jax.lax.broadcasted_iota(jnp.int32, x.shape, 1)        # (tn, C)
    x_t = jnp.sum(jnp.where(col == t, x, 0.0), axis=1, keepdims=True)
    s_x = jnp.sum(x, axis=1, keepdims=True)

    u = (1.0 - smoothing_coeff) / n_classes
    loss = m + jnp.log(sumexp) - smoothing_coeff * x_t - u * s_x
    # TODO(synk): no ignore_index=-100 masking (PyTorch CrossEntropyLoss default
    # is not exercised by this forward; padded/garbage tail rows are clipped by
    # the partial output block and never reach HBM).
    out_ref[...] = loss.astype(out_ref.dtype)


def _ls_ce_tiled_kernel(pred_ref, tgt_ref, out_ref, m_sc, l_sc, w_sc, *,
                        smoothing_coeff, n_classes, class_tile):
    """Class-axis tiled path: online logsumexp + running weighted sum."""
    k = pl.program_id(1)

    @pl.when(k == 0)
    def _init():
        m_sc[...] = jnp.full(m_sc.shape, -jnp.inf, m_sc.dtype)
        l_sc[...] = jnp.zeros(l_sc.shape, l_sc.dtype)
        w_sc[...] = jnp.zeros(w_sc.shape, w_sc.dtype)

    x = pred_ref[...].astype(jnp.float32)                        # (tn, tc)
    t = tgt_ref[...]                                             # (tn, 1) int32
    col = k * class_tile + jax.lax.broadcasted_iota(jnp.int32, x.shape, 1)

    if n_classes % class_tile != 0:
        # Mask the padded tail columns of the last class block.
        valid = col < n_classes
        x_lse = jnp.where(valid, x, -jnp.inf)
        x_sum = jnp.where(valid, x, 0.0)
    else:
        x_lse = x
        x_sum = x

    # Online logsumexp over class blocks.
    m_prev = m_sc[...]
    m_new = jnp.maximum(m_prev, jnp.max(x_lse, axis=1, keepdims=True))
    l_sc[...] = (jnp.exp(m_prev - m_new) * l_sc[...]
                 + jnp.sum(jnp.exp(x_lse - m_new), axis=1, keepdims=True))
    m_sc[...] = m_new

    # Running smoothed target + uniform contribution (weights are k-invariant).
    x_t = jnp.sum(jnp.where(col == t, x, 0.0), axis=1, keepdims=True)
    s_x = jnp.sum(x_sum, axis=1, keepdims=True)
    u = (1.0 - smoothing_coeff) / n_classes
    w_sc[...] += smoothing_coeff * x_t + u * s_x

    @pl.when(k == pl.num_programs(1) - 1)
    def _finalize():
        loss = m_sc[...] + jnp.log(l_sc[...]) - w_sc[...]
        out_ref[...] = loss.astype(out_ref.dtype)


# ---------------------------------------------------------------------------
# Tiling heuristics
# ---------------------------------------------------------------------------
def _round_up(x, m):
    return (x + m - 1) // m * m


def _choose_row_tile(n_rows, block_classes, itemsize):
    """Row tile (multiple of 128): ~4 MiB of logits per block, cap 8192 rows,
    keep >= 4 grid steps when the problem is big enough (v7x megacore +
    double-buffering), never exceed the rounded-up row count."""
    tn = (_TARGET_BLOCK_BYTES // max(block_classes * itemsize, 1)) // 128 * 128
    tn = max(128, min(tn, 8192))
    quarter = _round_up(max(n_rows // 4, 1), 128)
    tn = min(tn, quarter)
    tn = min(tn, _round_up(n_rows, 128))
    return int(tn)


# ---------------------------------------------------------------------------
# Wrapper
# ---------------------------------------------------------------------------
def label_smoothed_cross_entropy(pred, target, smoothing_coeff, *,
                                 row_tile=None, class_tile=None):
    """pred: (N, C) or (N, C, *spatial) logits in their native dtype;
    target: (N,) or (N, *spatial) int class indices.
    Returns float32 loss of shape (N,) or (N, *spatial)."""
    pred = jnp.asarray(pred)
    if pred.dtype.itemsize > 4:           # f64 etc. -> f32
        pred = pred.astype(jnp.float32)
    target = jnp.asarray(target)
    if target.dtype != jnp.int32:
        target = target.astype(jnp.int32)

    N, C = pred.shape[0], pred.shape[1]
    spatial = pred.shape[2:]
    if spatial:
        # TODO(synk): handle the (N, C, *spatial) layout directly in-kernel
        # (class axis on sublanes) to avoid this extra relayout pass; it is at
        # least kept in the source dtype so it is a single extra pass.
        pred2d = jnp.moveaxis(pred, 1, -1).reshape(-1, C)
        tgt1d = target.reshape(-1)
    else:
        pred2d = pred
        tgt1d = target.reshape(-1)

    R = pred2d.shape[0]
    tgt2d = tgt1d.reshape(R, 1)
    itemsize = pred2d.dtype.itemsize
    s = float(smoothing_coeff)

    # Single-pass if the whole class row fits a ~4 MiB block with >=256 rows.
    if class_tile is None:
        single_pass = C * itemsize <= _TARGET_BLOCK_BYTES // 256
        tc = C if single_pass else min(4096, _round_up(C, 128))
    else:
        tc = max(128, int(class_tile) // 128 * 128)
        single_pass = tc >= C
        if single_pass:
            tc = C

    col_buf = 512  # bytes/row of a lane-padded (tn,1) VMEM buffer ((8,128) tile)

    if single_pass:
        tn = int(row_tile) if row_tile else _choose_row_tile(R, C, itemsize)
        grid = (pl.cdiv(R, tn),)
        kernel = functools.partial(_ls_ce_kernel,
                                   smoothing_coeff=s, n_classes=C)
        grid_spec = pltpu.PrefetchScalarGridSpec(
            num_scalar_prefetch=0,
            grid=grid,
            in_specs=[pl.BlockSpec((tn, C), lambda i: (i, 0)),    # logits tile
                      pl.BlockSpec((tn, 1), lambda i: (i, 0))],   # targets
            out_specs=pl.BlockSpec((tn, 1), lambda i: (i, 0)),    # loss column
        )
        dim_sem = ("parallel",)
        need = 2 * tn * C * itemsize + 4 * tn * col_buf
    else:
        tn = int(row_tile) if row_tile else _choose_row_tile(R, tc, itemsize)
        grid = (pl.cdiv(R, tn), pl.cdiv(C, tc))                   # reduction last
        kernel = functools.partial(_ls_ce_tiled_kernel,
                                   smoothing_coeff=s, n_classes=C,
                                   class_tile=tc)
        grid_spec = pltpu.PrefetchScalarGridSpec(
            num_scalar_prefetch=0,
            grid=grid,
            in_specs=[pl.BlockSpec((tn, tc), lambda i, k: (i, k)),
                      pl.BlockSpec((tn, 1), lambda i, k: (i, 0))],
            out_specs=pl.BlockSpec((tn, 1), lambda i, k: (i, 0)),
            scratch_shapes=[pltpu.VMEM((tn, 1), jnp.float32)] * 3,
        )
        dim_sem = ("parallel", "arbitrary")
        need = 2 * tn * tc * itemsize + 7 * tn * col_buf

    # Explicit scoped-VMEM budget (covers the lane-padded column buffers too);
    # matters on v5e whose default scoped limit is only 16 MiB.
    vmem_limit = int(min(60 << 20, max(32 << 20, need + (4 << 20))))

    cost = pl.CostEstimate(
        flops=int(6 * R * C),
        transcendentals=int(R * C),
        bytes_accessed=int(R * C * itemsize + 2 * R * 4),
    )

    loss = pl.pallas_call(
        kernel,
        out_shape=jax.ShapeDtypeStruct((R, 1), jnp.float32),
        grid_spec=grid_spec,
        compiler_params=pltpu.CompilerParams(
            dimension_semantics=dim_sem,
            vmem_limit_bytes=vmem_limit),
        cost_estimate=cost,
    )(pred2d, tgt2d)

    loss = loss.reshape(R)
    return loss.reshape((N,) + spatial) if spatial else loss


# ---------------------------------------------------------------------------
# Pure-JAX reference of the PyTorch forward (2-D case)
# ---------------------------------------------------------------------------
def _reference(pred, target, smoothing_coeff):
    pred = pred.astype(jnp.float32)
    lse = jax.nn.logsumexp(pred, axis=1)
    ce_t = lse - jnp.take_along_axis(pred, target[:, None], axis=1)[:, 0]
    ce_u = lse - jnp.mean(pred, axis=1)
    return smoothing_coeff * ce_t + (1.0 - smoothing_coeff) * ce_u


if __name__ == "__main__":
    smoothing = 0.1
    key = jax.random.PRNGKey(0)
    k1, k2, k3, k4, k5, k6, k7, k8 = jax.random.split(key, 8)
    ok = True

    # Case 1: plain 2-D, f32 (single-pass path, 2 row blocks).
    p1 = jax.random.normal(k1, (256, 128), jnp.float32)
    t1 = jax.random.randint(k2, (256,), 0, 128, jnp.int32)
    l1 = jax.block_until_ready(label_smoothed_cross_entropy(p1, t1, smoothing))
    ok &= l1.shape == (256,)
    ok &= bool(jnp.allclose(l1, _reference(p1, t1, smoothing), atol=1e-4, rtol=1e-5))

    # Case 2: bf16 logits, ragged row count (native-dtype input + partial tail block).
    p2 = (jax.random.normal(k3, (200, 384), jnp.float32) * 3.0).astype(jnp.bfloat16)
    t2 = jax.random.randint(k4, (200,), 0, 384, jnp.int32)
    l2 = jax.block_until_ready(label_smoothed_cross_entropy(p2, t2, smoothing))
    ok &= l2.shape == (200,)
    ok &= bool(jnp.allclose(l2, _reference(p2.astype(jnp.float32), t2, smoothing),
                            atol=1e-4, rtol=1e-5))

    # Case 3: forced class tiling with a masked tail class block (online-LSE path).
    p3 = jax.random.normal(k5, (96, 320), jnp.float32)
    t3 = jax.random.randint(k6, (96,), 0, 320, jnp.int32)
    l3 = jax.block_until_ready(
        label_smoothed_cross_entropy(p3, t3, smoothing, class_tile=128))
    ok &= l3.shape == (96,)
    ok &= bool(jnp.allclose(l3, _reference(p3, t3, smoothing), atol=1e-3, rtol=1e-5))

    # Case 4: spatial layout (N, C, S) / (N, S).
    p4 = jax.random.normal(k7, (2, 16, 8), jnp.float32)
    t4 = jax.random.randint(k8, (2, 8), 0, 16, jnp.int32)
    l4 = jax.block_until_ready(label_smoothed_cross_entropy(p4, t4, smoothing))
    r4 = _reference(jnp.moveaxis(p4, 1, -1).reshape(-1, 16),
                    t4.reshape(-1), smoothing).reshape(2, 8)
    ok &= l4.shape == (2, 8)
    ok &= bool(jnp.allclose(l4, r4, atol=1e-4, rtol=1e-5))

    assert ok, "label-smoothed CE kernel mismatch vs reference"
    print("KERNEL_OK")
</pallas_src>

<mosaic_0001>
module attributes {stable_mosaic.version = 11 : i64} {
  func.func @_ls_ce_kernel(%arg0: i32, %arg1: memref<128x128xf32, #tpu.memory_space<vmem>>, %arg2: memref<128x1xi32, #tpu.memory_space<vmem>>, %arg3: memref<128x1xf32, #tpu.memory_space<vmem>>) attributes {dimension_semantics = [#tpu.dimension_semantics<parallel>], iteration_bounds = array<i64: 2>, scalar_prefetch = 0 : i64, scratch_operands = 0 : i64, tpu.core_type = #tpu.core_type<tc>, window_params = [{transform_indices = @transform_0, window_bounds = array<i64: 128, 128>}, {transform_indices = @transform_1, window_bounds = array<i64: 128, 1>}, {transform_indices = @transform_2, window_bounds = array<i64: 128, 1>}]} {
    %c0 = arith.constant 0 : index
    %c0_0 = arith.constant 0 : index
    %0 = vector.load %arg1[%c0, %c0_0] : memref<128x128xf32, #tpu.memory_space<vmem>>, vector<128x128xf32>
    %c0_1 = arith.constant 0 : index
    %c0_2 = arith.constant 0 : index
    %1 = vector.load %arg2[%c0_1, %c0_2] : memref<128x1xi32, #tpu.memory_space<vmem>>, vector<128x1xi32>
    %cst = arith.constant dense<0xFF800000> : vector<128xf32>
    %2 = vector.multi_reduction <maximumf>, %0, %cst [1] : vector<128x128xf32> to vector<128xf32>
    %3 = vector.shape_cast %2 : vector<128xf32> to vector<128x1xf32>
    %4 = vector.broadcast %3 : vector<128x1xf32> to vector<128x128xf32>
    %5 = arith.subf %0, %4 : vector<128x128xf32>
    %6 = math.exp %5 : vector<128x128xf32>
    %cst_3 = arith.constant dense<0.000000e+00> : vector<128xf32>
    %7 = vector.multi_reduction <add>, %6, %cst_3 [1] : vector<128x128xf32> to vector<128xf32>
    %8 = vector.shape_cast %7 : vector<128xf32> to vector<128x1xf32>
    %9 = tpu.iota {dimensions = array<i32: 1>} : vector<128x128xi32>
    %10 = vector.broadcast %1 : vector<128x1xi32> to vector<128x128xi32>
    %11 = arith.cmpi eq, %9, %10 : vector<128x128xi32>
    %cst_4 = arith.constant 0.000000e+00 : f32
    %12 = vector.broadcast %cst_4 : f32 to vector<128x128xf32>
    %13 = arith.select %11, %0, %12 : vector<128x128xi1>, vector<128x128xf32>
    %cst_5 = arith.constant dense<0.000000e+00> : vector<128xf32>
    %14 = vector.multi_reduction <add>, %13, %cst_5 [1] : vector<128x128xf32> to vector<128xf32>
    %15 = vector.shape_cast %14 : vector<128xf32> to vector<128x1xf32>
    %cst_6 = arith.constant dense<0.000000e+00> : vector<128xf32>
    %16 = vector.multi_reduction <add>, %0, %cst_6 [1] : vector<128x128xf32> to vector<128xf32>
    %17 = vector.shape_cast %16 : vector<128xf32> to vector<128x1xf32>
    %18 = math.log %8 : vector<128x1xf32>
    %19 = arith.addf %3, %18 : vector<128x1xf32>
    %cst_7 = arith.constant 1.000000e-01 : f32
    %20 = vector.broadcast %cst_7 : f32 to vector<128x1xf32>
    %21 = arith.mulf %20, %15 : vector<128x1xf32>
    %22 = arith.subf %19, %21 : vector<128x1xf32>
    %cst_8 = arith.constant 7.031250e-03 : f32
    %23 = vector.broadcast %cst_8 : f32 to vector<128x1xf32>
    %24 = arith.mulf %23, %17 : vector<128x1xf32>
    %25 = arith.subf %22, %24 : vector<128x1xf32>
    %c0_9 = arith.constant 0 : index
    %c0_10 = arith.constant 0 : index
    %26 = vector.load %arg3[%c0_9, %c0_10] : memref<128x1xf32, #tpu.memory_space<vmem>>, vector<128x1xf32>
    tpu.vector_store %arg3[%c0_9, %c0_10], %25 {strides = array<i32>} : memref<128x1xf32, #tpu.memory_space<vmem>>, vector<128x1xf32>,
    return
  }
  func.func @transform_0(%arg0: i32) -> (i32, i32) {
    %c0_i32 = arith.constant 0 : i32
    %c0_i32_0 = arith.constant 0 : i32
    return %arg0, %c0_i32 : i32, i32
  }
  func.func @transform_1(%arg0: i32) -> (i32, i32) {
    %c0_i32 = arith.constant 0 : i32
    %c0_i32_0 = arith.constant 0 : i32
    return %arg0, %c0_i32 : i32, i32
  }
  func.func @transform_2(%arg0: i32) -> (i32, i32) {
    %c0_i32 = arith.constant 0 : i32
    %c0_i32_0 = arith.constant 0 : i32
    return %arg0, %c0_i32 : i32, i32
  }
}

</mosaic_0001>

<bundles_post_ra>
// kernel: tpu_custom_call.1
= control target key start
LH: loop header
LB: loop body
LE: loop exit
PB: predicated region body
PF: predicated region fallthrough
CT: control target
= control target key end

     0   :  { %s768_s9 = smov 0   ;;  %s1071_s0 = inlined_call_operand.vmem [shape: f32[256,128], index: 0, kind: input, shape index: {}]   ;;  %s1072_s1 = inlined_call_operand.vmem [shape: s32[256,1], index: 1, kind: input, shape index: {}]   ;;  %s1073_s2 = inlined_call_operand.vmem [shape: f32[256,1], index: 2, kind: output, shape index: {}]  }
   0x1 LB: > { %s656_s10 = sadd.s32 4294967295, %s750_s9   ;;  %p660_p0 = scmp.ge.s32.totalorder %s750_s9, 1  ;;  %s750_s9 = sphi %s768_s9, %s12_s9  }
   0x2   : > { %p124_p1 = scmp.lt.s32.totalorder %s750_s9, 3 }
   0x4   : > { %p125_p2 = pnand %p660_p0, %p124_p1 }
   0x5   : > { %s661_s11 = sshll.u32 (!%p125_p2), %s656_s10, 4  ;;  %v752_v0 = vmov (!%p125_p2), 0   ;;  %v313_v47 = vlaneseq (!%p125_p2) }
   0x6   : > { %128 = sbr.rel (%p125_p2) target bundleno = 444 (0x1bc), region = 28  ;;  %p152_p3 = scmp.lt.s32.totalorder (!%p125_p2), %s661_s11, 31  ;;  %679 = vset.pattern.permute.xlu1 (!%p125_p2), %v752_v0  ;;  %678 = vset.pattern.permute.xlu0 (!%p125_p2), %v752_v0 }
   0x7   : > { %v882_v49 = vand.u32 (!%p125_p2), 127, %v313_v47 }
   0xd   : > { %s1075_s11 = smov (!%p152_p3, %s661_s11), 31 }
   0xe   : > { %s776_s12 = sshll.u32 %s1075_s11, 3 }
   0xf   : > { %s155_s15 = scalar_lea.vmem %s1071_s0, %s776_s12  ;;  %s834_s18 = scalar_lea.vmem %s1072_s1, %s776_s12 }
  0x10   : > { %v782_v1 = vld [vmem:[%s155_s15 + $0x10] sm:$0xff]  ;;  %v784_v2 = vld [vmem:[%s155_s15] sm:$0xff]  ;;  %v788_v3 = vld [vmem:[%s155_s15 + $0x18] sm:$0xff]  ;;  %s1005_s21 = scalar_lea.vmem %s1073_s2, %s776_s12 }
  0x11   : > { %205 = vmax.xlane.f32.xlu1 %v782_v1  ;;  %201 = vmax.xlane.f32.xlu0 %v784_v2  ;;  %v790_v4 = vld [vmem:[%s155_s15 + $0x8] sm:$0xff]  ;;  %v796_v6 = vld [vmem:[%s155_s15 + $0x20] sm:$0xff]  ;;  %v800_v7 = vld [vmem:[%s155_s15 + $0x38] sm:$0xff] }
  0x12   : > { %v794_v5 = vld [vmem:[%s155_s15 + $0x28] sm:$0xff]  ;;  %v802_v8 = vld [vmem:[%s155_s15 + $0x30] sm:$0xff]  ;;  %v808_v10 = vld [vmem:[%s155_s15 + $0x40] sm:$0xff] }
  0x13   : > { %v806_v9 = vld [vmem:[%s155_s15 + $0x48] sm:$0xff]  ;;  %v812_v11 = vld [vmem:[%s155_s15 + $0x58] sm:$0xff]  ;;  %v814_v12 = vld [vmem:[%s155_s15 + $0x50] sm:$0xff] }
  0x14   : > { %v818_v13 = vld [vmem:[%s155_s15 + $0x68] sm:$0xff]  ;;  %v820_v14 = vld [vmem:[%s155_s15 + $0x60] sm:$0xff]  ;;  %v824_v15 = vld [vmem:[%s155_s15 + $0x78] sm:$0xff] }
  0x15   : > { %207 = vmax.xlane.f32.xlu1 %v788_v3  ;;  %203 = vmax.xlane.f32.xlu0 %v790_v4  ;;  %v826_v16 = vld [vmem:[%s155_s15 + $0x70] sm:$0xff]  ;;  %v186_v17 = vld [vmem:[%s834_s18 + $0x8] sm:$0xff]  ;;  %v185_v19 = vld [vmem:[%s834_s18] sm:$0xff] }
  0x16   : > { %v187_v18 = vld [vmem:[%s834_s18 + $0x10] sm:$0xff]  ;;  %v188_v20 = vld [vmem:[%s834_s18 + $0x18] sm:$0xff]  ;;  %v194_v21 = vld [vmem:[%s834_s18 + $0x48] sm:$0xff] }
  0x17   : > { %v189_v22 = vld [vmem:[%s834_s18 + $0x20] sm:$0xff]  ;;  %v196_v23 = vld [vmem:[%s834_s18 + $0x58] sm:$0xff]  ;;  %v190_v24 = vld [vmem:[%s834_s18 + $0x28] sm:$0xff] }
  0x18   : > { %v198_v25 = vld [vmem:[%s834_s18 + $0x68] sm:$0xff]  ;;  %v191_v26 = vld [vmem:[%s834_s18 + $0x30] sm:$0xff]  ;;  %v200_v27 = vld [vmem:[%s834_s18 + $0x78] sm:$0xff] }
  0x19   : > { %211 = vmax.xlane.f32.xlu1 %v794_v5  ;;  %209 = vmax.xlane.f32.xlu0 %v796_v6  ;;  %v192_v28 = vld [vmem:[%s834_s18 + $0x38] sm:$0xff]  ;;  %v193_v29 = vld [vmem:[%s834_s18 + $0x40] sm:$0xff]  ;;  %v195_v30 = vld [vmem:[%s834_s18 + $0x50] sm:$0xff] }
  0x1a   : > { %v197_v31 = vld [vmem:[%s834_s18 + $0x60] sm:$0xff]  ;;  %v199_v32 = vld [vmem:[%s834_s18 + $0x70] sm:$0xff] }
  0x1d   : > { %215 = vmax.xlane.f32.xlu1 %v800_v7  ;;  %213 = vmax.xlane.f32.xlu0 %v802_v8 }
  0x21   : > { %219 = vmax.xlane.f32.xlu1 %v806_v9  ;;  %217 = vmax.xlane.f32.xlu0 %v808_v10 }
  0x25   : > { %223 = vmax.xlane.f32.xlu1 %v812_v11  ;;  %221 = vmax.xlane.f32.xlu0 %v814_v12 }
  0x29   : > { %227 = vmax.xlane.f32.xlu1 %v818_v13  ;;  %225 = vmax.xlane.f32.xlu0 %v820_v14 }
  0x2d   : > { %231 = vmax.xlane.f32.xlu1 %v824_v15  ;;  %229 = vmax.xlane.f32.xlu0 %v826_v16 }
  0x3e   : > { %319 = vperm.xlu1 %679, %v186_v17  }
  0x42   : > { %322 = vperm.xlu1 %679, %v187_v18  }
  0x43   : > { %316 = vperm.xlu0 %678, %v185_v19  }
  0x46   : > { %325 = vperm.xlu1 %679, %v188_v20  }
  0x47   : > { %343 = vperm.xlu0 %678, %v194_v21  }
  0x4a   : > { %328 = vperm.xlu1 %679, %v189_v22  }
  0x4b   : > { %349 = vperm.xlu0 %678, %v196_v23  }
  0x4e   : > { %331 = vperm.xlu1 %679, %v190_v24  }
  0x4f   : > { %355 = vperm.xlu0 %678, %v198_v25  }
  0x52   : > { %334 = vperm.xlu1 %679, %v191_v26  }
  0x53   : > { %361 = vperm.xlu0 %678, %v200_v27  }
  0x56   : > { %337 = vperm.xlu1 %679, %v192_v28  }
  0x5a   : > { %340 = vperm.xlu1 %679, %v193_v29  }
  0x5e   : > { %346 = vperm.xlu1 %679, %v195_v30  }
  0x62   : > { %352 = vperm.xlu1 %679, %v197_v31  }
  0x66   : > { %358 = vperm.xlu1 %679, %v199_v32  }
  0x9e   : > { %v852_v33 = vpop.xlane.xlu1 %205  ;;  %v854_v34 = vpop.xlane.xlu0 %201 }
  0x9f   : > { %v233_v57 = vsub.f32 %v784_v2, %v854_v34  ;;  %v235_v60 = vsub.f32 %v782_v1, %v852_v33 }
  0xa1   : > { %v249_v61 = vmul.f32 1.442695, %v233_v57  ;;  %v253_v17 = vmul.f32 1.442695, %v235_v60 }
  0xa2   : > { %v856_v35 = vpop.xlane.xlu1 %207  ;;  %v858_v36 = vpop.xlane.xlu0 %203 }
  0xa3   : > { %v234_v62 = vsub.f32 %v790_v4, %v858_v36  ;;  %v236_v18 = vsub.f32 %v788_v3, %v856_v35  ;;  %680 = vpow2.f32 %v249_v61 }
  0xa4   : > { %682 = vpow2.f32 %v253_v17 }
  0xa5   : > { %v251_v19 = vmul.f32 1.442695, %v234_v62  ;;  %v255_v23 = vmul.f32 1.442695, %v236_v18 }
  0xa6   : > { %v860_v37 = vpop.xlane.xlu1 %211  ;;  %v862_v38 = vpop.xlane.xlu0 %209 }
  0xa7   : > { %v237_v20 = vsub.f32 %v796_v6, %v862_v38  ;;  %v238_v24 = vsub.f32 %v794_v5, %v860_v37  ;;  %684 = vpow2.f32 %v251_v19 }
  0xa8   : > { %686 = vpow2.f32 %v255_v23 }
  0xa9   : > { %v257_v25 = vmul.f32 1.442695, %v237_v20  ;;  %v259_v29 = vmul.f32 1.442695, %v238_v24 }
  0xaa   : > { %v864_v39 = vpop.xlane.xlu1 %215  ;;  %v866_v40 = vpop.xlane.xlu0 %213 }
  0xab   : > { %v239_v26 = vsub.f32 %v802_v8, %v866_v40  ;;  %v240_v30 = vsub.f32 %v800_v7, %v864_v39  ;;  %688 = vpow2.f32 %v257_v25 }
  0xac   : > { %690 = vpow2.f32 %v259_v29 }
  0xad   : > { %v261_v31 = vmul.f32 1.442695, %v239_v26 }
  0xae   : > { %v868_v41 = vpop.xlane.xlu1 %219  ;;  %v870_v42 = vpop.xlane.xlu0 %217 }
  0xaf   : > { %v241_v32 = vsub.f32 %v808_v10, %v870_v42  ;;  %692 = vpow2.f32 %v261_v31 }
  0xb2   : > { %v872_v43 = vpop.xlane.xlu1 %223  ;;  %v874_v44 = vpop.xlane.xlu0 %221 }
  0xb3   : > { %v244_v60 = vsub.f32 %v812_v11, %v872_v43 }
  0xb5   : > { %v271_v17 = vmul.f32 1.442695, %v244_v60 }
  0xb6   : > { %v876_v45 = vpop.xlane.xlu1 %227  ;;  %v878_v46 = vpop.xlane.xlu0 %225 }
  0xb7   : > { %v245_v62 = vsub.f32 %v820_v14, %v878_v46  ;;  %v246_v18 = vsub.f32 %v818_v13, %v876_v45 }
  0xb9   : > { %v273_v19 = vmul.f32 1.442695, %v245_v62  ;;  %v275_v23 = vmul.f32 1.442695, %v246_v18 }
  0xba   : > { %v880_v48 = vpop.xlane.xlu1 %231  ;;  %v884_v50 = vpop.xlane.xlu0 %229 }
  0xbb   : > { %v247_v20 = vsub.f32 %v826_v16, %v884_v50  ;;  %v248_v24 = vsub.f32 %v824_v15, %v880_v48 }
  0xbd   : > { %v277_v25 = vmul.f32 1.442695, %v247_v20 }
  0xbe   : > { %v320_v51 = vpop.permute.xlu1 %319 }
  0xbf   : > { %vm364_vm0 = vcmp.eq.s32.totalorder %v882_v49, %v320_v51  ;;  %v681_v51 = vpop.eup %680 }
  0xc0   : > { %v380_v52 = vsel %vm364_vm0, %v790_v4, 0.0  ;;  %v683_v57 = vpop.eup %682  ;;  %vm571_vm0 = vcmask 7168  }
  0xc1   : > { %397 = vadd.xlane.f32.xlu0 %v380_v52 }
  0xc2   : > { %v323_v53 = vpop.permute.xlu1 %322  ;;  %v317_v54 = vpop.permute.xlu0 %316 }
  0xc3   : > { %vm365_vm1 = vcmp.eq.s32.totalorder %v882_v49, %v323_v53  ;;  %vm363_vm2 = vcmp.eq.s32.totalorder %v882_v49, %v317_v54  ;;  %v263_v53 = vmul.f32 1.442695, %v240_v30  ;;  %v242_v54 = vsub.f32 %v806_v9, %v868_v41 }
  0xc4   : > { %v381_v55 = vsel %vm365_vm1, %v782_v1, 0.0  ;;  %v379_v56 = vsel %vm363_vm2, %v784_v2, 0.0 }
  0xc5   : > { %399 = vadd.xlane.f32.xlu0 %v381_v55  ;;  %395 = vadd.xlane.f32.xlu1 %v379_v56  ;;  %v265_v55 = vmul.f32 1.442695, %v241_v32  ;;  %v243_v56 = vsub.f32 %v814_v12, %v874_v44  ;;  %694 = vpow2.f32 %v263_v53 }
  0xc6   : > { %v326_v58 = vpop.permute.xlu1 %325 }
  0xc7   : > { %vm366_vm3 = vcmp.eq.s32.totalorder %v882_v49, %v326_v58  ;;  %v685_v58 = vpop.eup %684  ;;  %696 = vpow2.f32 %v265_v55  ;;  %v269_v61 = vmul.f32 1.442695, %v243_v56 }
  0xc8   : > { %v382_v59 = vsel %vm366_vm3, %v788_v3, 0.0 }
  0xc9   : > { %401 = vadd.xlane.f32.xlu1 %v382_v59  ;;  %v267_v59 = vmul.f32 1.442695, %v242_v54 }
  0xca   : > { %v329_v63 = vpop.permute.xlu1 %328 }
  0xcb   : > { %vm367_vm4 = vcmp.eq.s32.totalorder %v882_v49, %v329_v63  ;;  %v687_v63 = vpop.eup %686  ;;  %698 = vpow2.f32 %v267_v59 }
  0xcc   : > { %v383_v0 = vsel %vm367_vm4, %v796_v6, 0.0  ;;  %700 = vpow2.f32 %v269_v61 }
  0xcd   : > { %403 = vadd.xlane.f32.xlu0 %v383_v0  ;;  %v689_v0 = vpop.eup %688  ;;  %702 = vpow2.f32 %v271_v17 }
  0xce   : > { %v332_v21 = vpop.permute.xlu1 %331  ;;  %704 = vpow2.f32 %v273_v19 }
  0xcf   : > { %vm368_vm5 = vcmp.eq.s32.totalorder %v882_v49, %v332_v21  ;;  %v691_v21 = vpop.eup %690  ;;  %706 = vpow2.f32 %v275_v23 }
  0xd0   : > { %v384_v22 = vsel %vm368_vm5, %v794_v5, 0.0  ;;  %708 = vpow2.f32 %v277_v25 }
  0xd1   : > { %405 = vadd.xlane.f32.xlu1 %v384_v22  ;;  %v693_v22 = vpop.eup %692 }
  0xd2   : > { %v335_v27 = vpop.permute.xlu1 %334  ;;  %v695_v26 = vpop.eup %694 }
  0xd3   : > { %vm369_vm6 = vcmp.eq.s32.totalorder %v882_v49, %v335_v27  ;;  %v697_v27 = vpop.eup %696 }
  0xd4   : > { %v385_v28 = vsel %vm369_vm6, %v802_v8, 0.0 }
  0xd5   : > { %407 = vadd.xlane.f32.xlu0 %v385_v28  ;;  %v279_v28 = vmul.f32 1.442695, %v248_v24  ;;  %v699_v29 = vpop.eup %698 }
  0xd6   : > { %v338_v47 = vpop.permute.xlu1 %337  ;;  %v701_v30 = vpop.eup %700 }
  0xd7   : > { %vm370_vm7 = vcmp.eq.s32.totalorder %v882_v49, %v338_v47  ;;  %710 = vpow2.f32 %v279_v28  ;;  %v703_v32 = vpop.eup %702 }
  0xd8   : > { %v386_v52 = vsel %vm370_vm7, %v800_v7, 0.0  ;;  %v705_v47 = vpop.eup %704 }
  0xd9   : > { %281 = vadd.xlane.f32.xlu0 %v681_v51  ;;  %409 = vadd.xlane.f32.xlu1 %v386_v52  ;;  %v344_v51 = vpop.permute.xlu0 %343  ;;  %v707_v53 = vpop.eup %706 }
  0xda   : > { %v341_v31 = vpop.permute.xlu1 %340  ;;  %v709_v54 = vpop.eup %708  ;;  %vm372_vm9 = vcmp.eq.s32.totalorder %v882_v49, %v344_v51 }
  0xdb   : > { %vm371_vm8 = vcmp.eq.s32.totalorder %v882_v49, %v341_v31  ;;  %v388_v61 = vsel %vm372_vm9, %v806_v9, 0.0 }
  0xdd   : > { %285 = vadd.xlane.f32.xlu0 %v683_v57  ;;  %283 = vadd.xlane.f32.xlu1 %v685_v58  ;;  %v350_v55 = vpop.permute.xlu0 %349  ;;  %v387_v58 = vsel %vm371_vm8, %v808_v10, 0.0 }
  0xde   : > { %v347_v52 = vpop.permute.xlu1 %346  ;;  %vm374_vm11 = vcmp.eq.s32.totalorder %v882_v49, %v350_v55 }
  0xdf   : > { %vm373_vm10 = vcmp.eq.s32.totalorder %v882_v49, %v347_v52 }
  0xe0   : > { %v389_v60 = vsel %vm373_vm10, %v814_v12, 0.0 }
  0xe1   : > { %289 = vadd.xlane.f32.xlu0 %v689_v0  ;;  %287 = vadd.xlane.f32.xlu1 %v687_v63  ;;  %v711_v56 = vpop.eup %710  ;;  %v356_v59 = vpop.permute.xlu0 %355  ;;  %v390_v0 = vsel %vm374_vm11, %v812_v11, 0.0 }
  0xe2   : > { %v353_v57 = vpop.permute.xlu1 %352  ;;  %vm376_vm13 = vcmp.eq.s32.totalorder %v882_v49, %v356_v59 }
  0xe3   : > { %vm375_vm12 = vcmp.eq.s32.totalorder %v882_v49, %v353_v57  ;;  %v392_v19 = vsel %vm376_vm13, %v818_v13, 0.0 }
  0xe4   : > { %v391_v63 = vsel %vm375_vm12, %v820_v14, 0.0 }
  0xe5   : > { %293 = vadd.xlane.f32.xlu0 %v693_v22  ;;  %291 = vadd.xlane.f32.xlu1 %v691_v21  ;;  %v362_v17 = vpop.permute.xlu0 %361 }
  0xe6   : > { %v359_v62 = vpop.permute.xlu1 %358  ;;  %vm378_vm15 = vcmp.eq.s32.totalorder %v882_v49, %v362_v17 }
  0xe7   : > { %vm377_vm14 = vcmp.eq.s32.totalorder %v882_v49, %v359_v62  ;;  %v394_v20 = vsel %vm378_vm15, %v824_v15, 0.0 }
  0xe8   : > { %v393_v18 = vsel %vm377_vm14, %v826_v16, 0.0 }
  0xe9   : > { %297 = vadd.xlane.f32.xlu0 %v697_v27  ;;  %295 = vadd.xlane.f32.xlu1 %v695_v26 }
  0xed   : > { %301 = vadd.xlane.f32.xlu0 %v701_v30  ;;  %299 = vadd.xlane.f32.xlu1 %v699_v29 }
  0xf1   : > { %305 = vadd.xlane.f32.xlu0 %v705_v47  ;;  %303 = vadd.xlane.f32.xlu1 %v703_v32 }
  0xf5   : > { %309 = vadd.xlane.f32.xlu0 %v709_v54  ;;  %307 = vadd.xlane.f32.xlu1 %v707_v53 }
  0xf9   : > { %411 = vadd.xlane.f32.xlu0 %v387_v58  ;;  %311 = vadd.xlane.f32.xlu1 %v711_v56 }
  0xfd   : > { %415 = vadd.xlane.f32.xlu0 %v389_v60  ;;  %413 = vadd.xlane.f32.xlu1 %v388_v61 }
 0x101   : > { %419 = vadd.xlane.f32.xlu0 %v391_v63  ;;  %417 = vadd.xlane.f32.xlu1 %v390_v0 }
 0x105   : > { %423 = vadd.xlane.f32.xlu0 %v393_v18  ;;  %421 = vadd.xlane.f32.xlu1 %v392_v19 }
 0x109   : > { %427 = vadd.xlane.f32.xlu0 %v784_v2  ;;  %425 = vadd.xlane.f32.xlu1 %v394_v20 }
 0x10d   : > { %431 = vadd.xlane.f32.xlu0 %v782_v1  ;;  %429 = vadd.xlane.f32.xlu1 %v790_v4 }
 0x111   : > { %435 = vadd.xlane.f32.xlu0 %v796_v6  ;;  %433 = vadd.xlane.f32.xlu1 %v788_v3 }
 0x115   : > { %439 = vadd.xlane.f32.xlu0 %v802_v8  ;;  %437 = vadd.xlane.f32.xlu1 %v794_v5 }
 0x119   : > { %443 = vadd.xlane.f32.xlu0 %v808_v10  ;;  %441 = vadd.xlane.f32.xlu1 %v800_v7 }
 0x11d   : > { %447 = vadd.xlane.f32.xlu0 %v814_v12  ;;  %445 = vadd.xlane.f32.xlu1 %v806_v9 }
 0x121   : > { %451 = vadd.xlane.f32.xlu0 %v820_v14  ;;  %449 = vadd.xlane.f32.xlu1 %v812_v11 }
 0x125   : > { %455 = vadd.xlane.f32.xlu0 %v826_v16  ;;  %453 = vadd.xlane.f32.xlu1 %v818_v13 }
 0x129   : > { %457 = vadd.xlane.f32.xlu1 %v824_v15 }
 0x14e   : > { %v398_v1 = vpop.xlane.xlu0 %397 }
 0x152   : > { %v396_v2 = vpop.xlane.xlu1 %395  ;;  %v400_v3 = vpop.xlane.xlu0 %399 }
 0x153   : > { %v507_v61 = vmul.f32 0.1, %v396_v2 }
 0x156   : > { %v966_v4 = vpop.xlane.xlu1 %401 }
 0x15a   : > { %v968_v5 = vpop.xlane.xlu0 %403 }
 0x15e   : > { %v970_v6 = vpop.xlane.xlu1 %405 }
 0x162   : > { %v972_v7 = vpop.xlane.xlu0 %407 }
 0x166   : > { %v974_v8 = vpop.xlane.xlu1 %409  ;;  %v282_v9 = vpop.xlane.xlu0 %281 }
 0x167   : > { %712 = vlog2.f32 %v282_v9  ;;  %v508_v9 = vmul.f32 0.1, %v398_v1 }
 0x16a   : > { %v284_v10 = vpop.xlane.xlu1 %283  ;;  %v286_v11 = vpop.xlane.xlu0 %285 }
 0x16b   : > { %714 = vlog2.f32 %v284_v10 }
 0x16c   : > { %716 = vlog2.f32 %v286_v11 }
 0x16e   : > { %v288_v12 = vpop.xlane.xlu1 %287  ;;  %v290_v13 = vpop.xlane.xlu0 %289 }
 0x16f   : > { %718 = vlog2.f32 %v288_v12 }
 0x170   : > { %720 = vlog2.f32 %v290_v13  ;;  %v509_v13 = vmul.f32 0.1, %v400_v3 }
 0x171   : > { %v713_v31 = vpop.eup %712 }
 0x172   : > { %v292_v14 = vpop.xlane.xlu1 %291  ;;  %v294_v15 = vpop.xlane.xlu0 %293  ;;  %v460_v53 = vmul.f32 0.6931472, %v713_v31  ;;  %v510_v31 = vmul.f32 0.1, %v966_v4 }
 0x173   : > { %722 = vlog2.f32 %v292_v14 }
 0x174   : > { %724 = vlog2.f32 %v294_v15  ;;  %v491_v60 = vadd.f32 %v460_v53, %v854_v34 }
 0x175   : > { %v715_v32 = vpop.eup %714 }
 0x176   : > { %v296_v16 = vpop.xlane.xlu1 %295  ;;  %v298_v49 = vpop.xlane.xlu0 %297  ;;  %v462_v54 = vmul.f32 0.6931472, %v715_v32  ;;  %v523_v10 = vsub.f32 %v491_v60, %v507_v61  ;;  %v511_v32 = vmul.f32 0.1, %v968_v5  ;;  %v513_v61 = vmul.f32 0.1, %v972_v7 }
 0x177   : > { %v717_v52 = vpop.eup %716  ;;  %726 = vlog2.f32 %v296_v16  ;;  %v514_v7 = vmul.f32 0.1, %v974_v8 }
 0x178   : > { %v464_v56 = vmul.f32 0.6931472, %v717_v52  ;;  %728 = vlog2.f32 %v298_v49  ;;  %v492_v62 = vadd.f32 %v462_v54, %v858_v36 }
 0x179   : > { %v719_v55 = vpop.eup %718 }
 0x17a   : > { %v300_v21 = vpop.xlane.xlu1 %299  ;;  %v302_v22 = vpop.xlane.xlu0 %301  ;;  %v493_v63 = vadd.f32 %v464_v56, %v852_v33  ;;  %v466_v0 = vmul.f32 0.6931472, %v719_v55  ;;  %v524_v34 = vsub.f32 %v492_v62, %v508_v9 }
 0x17b   : > { %v721_v59 = vpop.eup %720  ;;  %730 = vlog2.f32 %v300_v21 }
 0x17c   : > { %v468_v17 = vmul.f32 0.6931472, %v721_v59  ;;  %732 = vlog2.f32 %v302_v22  ;;  %v494_v36 = vadd.f32 %v466_v0, %v856_v35  ;;  %v525_v15 = vsub.f32 %v493_v63, %v509_v13 }
 0x17d   : > { %v723_v20 = vpop.eup %722 }
 0x17e   : > { %v304_v23 = vpop.xlane.xlu1 %303  ;;  %v306_v24 = vpop.xlane.xlu0 %305  ;;  %v495_v2 = vadd.f32 %v468_v17, %v862_v38  ;;  %v470_v1 = vmul.f32 0.6931472, %v723_v20  ;;  %v526_v55 = vsub.f32 %v494_v36, %v510_v31 }
 0x17f   : > { %v725_v12 = vpop.eup %724  ;;  %734 = vlog2.f32 %v304_v23 }
 0x180   : > { %v472_v3 = vmul.f32 0.6931472, %v725_v12  ;;  %736 = vlog2.f32 %v306_v24  ;;  %v496_v53 = vadd.f32 %v470_v1, %v860_v37  ;;  %v527_v23 = vsub.f32 %v495_v2, %v511_v32 }
 0x181   : > { %v727_v49 = vpop.eup %726  ;;  %v512_v24 = vmul.f32 0.1, %v970_v6 }
 0x182   : > { %v976_v25 = vpop.xlane.xlu1 %307  ;;  %v978_v26 = vpop.xlane.xlu0 %309  ;;  %v474_v54 = vmul.f32 0.6931472, %v727_v49  ;;  %v497_v60 = vadd.f32 %v472_v3, %v866_v40 }
 0x183   : > { %v729_v52 = vpop.eup %728  ;;  %738 = vlog2.f32 %v976_v25  ;;  %v528_v17 = vsub.f32 %v496_v53, %v512_v24 }
 0x184   : > { %740 = vlog2.f32 %v978_v26  ;;  %v476_v62 = vmul.f32 0.6931472, %v729_v52  ;;  %v498_v25 = vadd.f32 %v474_v54, %v864_v39  ;;  %v529_v26 = vsub.f32 %v497_v60, %v513_v61 }
 0x185   : > { %v731_v37 = vpop.eup %730 }
 0x186   : > { %v980_v27 = vpop.xlane.xlu1 %311  ;;  %v982_v28 = vpop.xlane.xlu0 %411  ;;  %v499_v13 = vadd.f32 %v476_v62, %v870_v42  ;;  %v530_v2 = vsub.f32 %v498_v25, %v514_v7 }
 0x187   : > { %v733_v0 = vpop.eup %732  ;;  %v515_v9 = vmul.f32 0.1, %v982_v28  ;;  %742 = vlog2.f32 %v980_v27 }
 0x188   : > { %v480_v12 = vmul.f32 0.6931472, %v733_v0 }
 0x189   : > { %v735_v39 = vpop.eup %734 }
 0x18a   : > { %v984_v29 = vpop.xlane.xlu1 %413  ;;  %v986_v30 = vpop.xlane.xlu0 %415  ;;  %v482_v42 = vmul.f32 0.6931472, %v735_v39 }
 0x18b   : > { %v516_v36 = vmul.f32 0.1, %v984_v29  ;;  %v501_v29 = vadd.f32 %v480_v12, %v874_v44 }
 0x18e   : > { %v988_v47 = vpop.xlane.xlu1 %417  ;;  %v990_v51 = vpop.xlane.xlu0 %419 }
 0x18f   : > { %v519_v54 = vmul.f32 0.1, %v990_v51 }
 0x192   : > { %v992_v57 = vpop.xlane.xlu1 %421  ;;  %v994_v58 = vpop.xlane.xlu0 %423 }
 0x193   : > { %v520_v51 = vmul.f32 0.1, %v992_v57  ;;  %v521_v62 = vmul.f32 0.1, %v994_v58 }
 0x196   : > { %v999_v18 = vpop.xlane.xlu1 %425  ;;  %v428_v19 = vpop.xlane.xlu0 %427 }
 0x197   : > { %v539_v11 = vmul.f32 0.00703125, %v428_v19 }
 0x199   : > { %v555_v33 = vsub.f32 %v523_v10, %v539_v11  ;;  %v478_v11 = vmul.f32 0.6931472, %v731_v37 }
 0x19a   : > { %v430_v14 = vpop.xlane.xlu1 %429  ;;  %v432_v16 = vpop.xlane.xlu0 %431 }
 0x19b   : > { %572 = vst.msk [vmem:[%s1005_s21] sm:$0xff] %vm571_vm0, %v555_v33  ;;  %v540_v21 = vmul.f32 0.00703125, %v430_v14  ;;  %v541_v22 = vmul.f32 0.00703125, %v432_v16  ;;  %v500_v49 = vadd.f32 %v478_v11, %v868_v41 }
 0x19c   : > { %v517_v16 = vmul.f32 0.1, %v986_v30  ;;  %v518_v30 = vmul.f32 0.1, %v988_v47 }
 0x19d   : > { %v556_v35 = vsub.f32 %v524_v34, %v540_v21  ;;  %v557_v38 = vsub.f32 %v525_v15, %v541_v22  ;;  %v737_v34 = vpop.eup %736  ;;  %v531_v15 = vsub.f32 %v499_v13, %v515_v9  ;;  %v522_v9 = vmul.f32 0.1, %v999_v18 }
 0x19e   : > { %v434_v56 = vpop.xlane.xlu1 %433  ;;  %v436_v59 = vpop.xlane.xlu0 %435  ;;  %v484_v21 = vmul.f32 0.6931472, %v737_v34  ;;  %v533_v53 = vsub.f32 %v501_v29, %v517_v16 }
 0x19f   : > { %573 = vst.msk [vmem:[%s1005_s21 + $0x8] sm:$0xff] %vm571_vm0, %v556_v35  ;;  %574 = vst.msk [vmem:[%s1005_s21 + $0x10] sm:$0xff] %vm571_vm0, %v557_v38  ;;  %v542_v4 = vmul.f32 0.00703125, %v434_v56  ;;  %v543_v5 = vmul.f32 0.00703125, %v436_v59  ;;  %v739_v3 = vpop.eup %738  ;;  %v532_v35 = vsub.f32 %v500_v49, %v516_v36  ;;  %v502_v56 = vadd.f32 %v482_v42, %v872_v43 }
 0x1a0   : > { %v741_v32 = vpop.eup %740  ;;  %v486_v44 = vmul.f32 0.6931472, %v739_v3  ;;  %v503_v59 = vadd.f32 %v484_v21, %v878_v46 }
 0x1a1   : > { %v558_v63 = vsub.f32 %v526_v55, %v542_v4  ;;  %v559_v40 = vsub.f32 %v527_v23, %v543_v5  ;;  %v488_v23 = vmul.f32 0.6931472, %v741_v32  ;;  %v743_v4 = vpop.eup %742  ;;  %v534_v5 = vsub.f32 %v502_v56, %v518_v30 }
 0x1a2   : > { %v438_v19 = vpop.xlane.xlu1 %437  ;;  %v440_v20 = vpop.xlane.xlu0 %439  ;;  %v535_v61 = vsub.f32 %v503_v59, %v519_v54  ;;  %v504_v46 = vadd.f32 %v486_v44, %v876_v45 }
 0x1a3   : > { %575 = vst.msk [vmem:[%s1005_s21 + $0x18] sm:$0xff] %vm571_vm0, %v558_v63  ;;  %576 = vst.msk [vmem:[%s1005_s21 + $0x20] sm:$0xff] %vm571_vm0, %v559_v40  ;;  %v544_v6 = vmul.f32 0.00703125, %v438_v19  ;;  %v545_v10 = vmul.f32 0.00703125, %v440_v20  ;;  %v505_v0 = vadd.f32 %v488_v23, %v884_v50 }
 0x1a4   : > { %v490_v40 = vmul.f32 0.6931472, %v743_v4 }
 0x1a5   : > { %v560_v33 = vsub.f32 %v528_v17, %v544_v6  ;;  %v561_v28 = vsub.f32 %v529_v26, %v545_v10  ;;  %v536_v17 = vsub.f32 %v504_v46, %v520_v51  ;;  %v537_v58 = vsub.f32 %v505_v0, %v521_v62 }
 0x1a6   : > { %v442_v1 = vpop.xlane.xlu1 %441  ;;  %v444_v14 = vpop.xlane.xlu0 %443  ;;  %v506_v26 = vadd.f32 %v490_v40, %v880_v48 }
 0x1a7   : > { %577 = vst.msk [vmem:[%s1005_s21 + $0x28] sm:$0xff] %vm571_vm0, %v560_v33  ;;  %578 = vst.msk [vmem:[%s1005_s21 + $0x30] sm:$0xff] %vm571_vm0, %v561_v28  ;;  %v546_v8 = vmul.f32 0.00703125, %v442_v1  ;;  %v547_v27 = vmul.f32 0.00703125, %v444_v14 }
 0x1a8   : > { %v538_v11 = vsub.f32 %v506_v26, %v522_v9 }
 0x1a9   : > { %v562_v22 = vsub.f32 %v530_v2, %v546_v8  ;;  %v563_v31 = vsub.f32 %v531_v15, %v547_v27 }
 0x1aa   : > { %v446_v38 = vpop.xlane.xlu1 %445  ;;  %v448_v52 = vpop.xlane.xlu0 %447 }
 0x1ab   : > { %579 = vst.msk [vmem:[%s1005_s21 + $0x38] sm:$0xff] %vm571_vm0, %v562_v22  ;;  %580 = vst.msk [vmem:[%s1005_s21 + $0x40] sm:$0xff] %vm571_vm0, %v563_v31  ;;  %v548_v41 = vmul.f32 0.00703125, %v446_v38  ;;  %v549_v55 = vmul.f32 0.00703125, %v448_v52 }
 0x1ad   : > { %v564_v47 = vsub.f32 %v532_v35, %v548_v41  ;;  %v565_v60 = vsub.f32 %v533_v53, %v549_v55 }
 0x1ae   : > { %v450_v24 = vpop.xlane.xlu1 %449  ;;  %v452_v37 = vpop.xlane.xlu0 %451 }
 0x1af   : > { %581 = vst.msk [vmem:[%s1005_s21 + $0x48] sm:$0xff] %vm571_vm0, %v564_v47  ;;  %582 = vst.msk [vmem:[%s1005_s21 + $0x50] sm:$0xff] %vm571_vm0, %v565_v60  ;;  %v550_v43 = vmul.f32 0.00703125, %v450_v24  ;;  %v551_v63 = vmul.f32 0.00703125, %v452_v37 }
 0x1b1   : > { %v566_v25 = vsub.f32 %v534_v5, %v550_v43  ;;  %v567_v57 = vsub.f32 %v535_v61, %v551_v63 }
 0x1b2   : > { %v454_v19 = vpop.xlane.xlu1 %453  ;;  %v456_v20 = vpop.xlane.xlu0 %455 }
 0x1b3   : > { %583 = vst.msk [vmem:[%s1005_s21 + $0x58] sm:$0xff] %vm571_vm0, %v566_v25  ;;  %584 = vst.msk [vmem:[%s1005_s21 + $0x60] sm:$0xff] %vm571_vm0, %v567_v57  ;;  %v552_v6 = vmul.f32 0.00703125, %v454_v19  ;;  %v553_v45 = vmul.f32 0.00703125, %v456_v20 }
 0x1b5   : > { %v568_v50 = vsub.f32 %v536_v17, %v552_v6  ;;  %v569_v10 = vsub.f32 %v537_v58, %v553_v45 }
 0x1b6   : > { %v458_v7 = vpop.xlane.xlu1 %457 }
 0x1b7   : > { %585 = vst.msk [vmem:[%s1005_s21 + $0x68] sm:$0xff] %vm571_vm0, %v568_v50  ;;  %586 = vst.msk [vmem:[%s1005_s21 + $0x70] sm:$0xff] %vm571_vm0, %v569_v10  ;;  %v554_v39 = vmul.f32 0.00703125, %v458_v7 }
 0x1b9   : > { %v570_v12 = vsub.f32 %v538_v11, %v554_v39 }
 0x1bb   : > { %587 = vst.msk [vmem:[%s1005_s21 + $0x78] sm:$0xff] %vm571_vm0, %v570_v12 }
 0x1bc PF: > { %s12_s9 = sadd.s32 1, %s750_s9  }
 0x1bd   : > { %p9_p4 = scmp.ge.s32.totalorder %s12_s9, 4  }
 0x1bf   :  { %11 = sbr.rel (!%p9_p4) target bundleno = 1 (0x1), region = 61 }

</bundles_post_ra>
